<compile_context>
chip_gen: v5e
topology: v5e:2x2
jax: 0.10.0
libtpu: 0.0.40
codegen_flags: <defaults>
</compile_context>

<pallas_src>
import functools

import jax
import jax.numpy as jnp
from jax.experimental import pallas as pl
from jax.experimental.pallas import tpu as pltpu

NCE_T = 0.07
INV_T = 1.0 / NCE_T
EPS = 1e-7


# --------------------------- Pallas kernel factory ---------------------------
def _make_fused_kernel(n_valid, NP, num_k):
    """Fused (all pyramid levels) RoI pooling + NCE loss.

    Grid = (level [parallel], k-tile over B*H rows [arbitrary]).

    n_valid: true number of boxes (mean divisor / masks)
    NP:      padded box count (multiple of 8, >= 16); rows 0..NP-1 = source
             RoIs (key), NP..2NP-1 = domain-swapped RoIs (query)
    num_k:   number of K-tiles along the B*H reduction axis
    """

    def kernel(wyb_ref, f_ref, wxc_ref, sel_ref, loss_ref, acc_ref):
        k = pl.program_id(1)

        @pl.when(k == 0)
        def _init():
            acc_ref[...] = jnp.zeros_like(acc_ref)

        # Stage 1: lane-dense pooling over (batch, y) rows.
        #   acc[2NP, W*C] += wyb[2NP, TBH] @ f[TBH, W*C]   (bf16 MXU, f32 acc)
        acc_ref[...] += jnp.dot(wyb_ref[...], f_ref[...],
                                preferred_element_type=jnp.float32)

        # ------------------------- per-level epilogue -------------------------
        @pl.when(k == num_k - 1)
        def _epilogue():
            # Stage 2: fold the per-box x weights (tiny VPU multiply) and sum
            # the W groups of C channels with one small selection matmul.
            g = acc_ref[...] * wxc_ref[...]                    # [2NP, WCmax] f32
            pooled = jnp.dot(g, sel_ref[...],
                             preferred_element_type=jnp.float32)  # [2NP, Cmax]
            sfea = pooled[:NP]        # source RoI features   (key)
            afea = pooled[NP:]        # domain-swapped RoI features (query)
            # TODO(synk): torch detaches feat_k (source); forward value is
            # identical, a custom_vjp would be needed for matching gradients.

            def l2norm(x):
                # Normalize(power=2): x / (sqrt(sum(x^2, 1)) + 1e-7); the
                # [NP,1] reciprocal goes through the (free) EUP slot.
                norm = jnp.sqrt(jnp.sum(x * x, axis=1, keepdims=True))
                return x * pl.reciprocal(norm + EPS, approx=True)

            feat_k = l2norm(sfea)
            feat_q = l2norm(afea)

            # positive logits: <q_i, k_i>
            l_pos = jnp.sum(feat_q * feat_k, axis=1, keepdims=True)        # [NP,1]
            # negative logits: q @ k^T, diagonal masked to -10 (before 1/T,
            # matching the torch masked_fill_ order)
            l_neg = jax.lax.dot_general(
                feat_q, feat_k, (((1,), (1,)), ((), ())),
                preferred_element_type=jnp.float32)                        # [NP,NP]
            row = jax.lax.broadcasted_iota(jnp.int32, (NP, NP), 0)
            col = jax.lax.broadcasted_iota(jnp.int32, (NP, NP), 1)
            l_neg = jnp.where(row == col, jnp.float32(-10.0), l_neg)
            # padded key columns must not leak into the softmax denominator
            l_neg = jnp.where(col < n_valid, l_neg, jnp.float32(-1e9))

            logit_pos = l_pos * INV_T
            logit_neg = l_neg * INV_T

            # CrossEntropyLoss(cat([l_pos, l_neg], 1)/T, target=0), mean over
            # the n_valid real rows.
            m = jnp.maximum(jnp.max(logit_neg, axis=1, keepdims=True), logit_pos)
            lse = m + jnp.log(jnp.exp(logit_pos - m) +
                              jnp.sum(jnp.exp(logit_neg - m), axis=1, keepdims=True))
            per_row = lse - logit_pos                                       # [NP,1]
            rvalid = jax.lax.broadcasted_iota(jnp.int32, (NP, 1), 0) < n_valid
            per_row = jnp.where(rvalid, per_row, jnp.float32(0.0))
            loss_ref[...] = (jnp.sum(per_row, axis=0, keepdims=True)
                             * jnp.float32(1.0 / n_valid))

    return kernel


# ------------------------------- JAX glue ------------------------------------
def _xywh2xyxy(x):
    cx, cy, w, h = x[:, 0], x[:, 1], x[:, 2], x[:, 3]
    return jnp.stack([cx - w / 2.0, cy - h / 2.0, cx + w / 2.0, cy + h / 2.0], axis=1)


def _axis_weight_sum(start, length, grid, size, max_grid):
    """Summed 1-D bilinear weights of an aligned RoIAlign axis (pooled size 1).

    start/length/grid: [n] roi start coord, roi extent, sampling-grid count.
    Returns [n, size] weights (summed over the sampling grid along this axis).
    """
    idx_i = jnp.arange(max_grid, dtype=jnp.int32)                       # [G]
    idx_f = idx_i.astype(jnp.float32)
    grid_f = jnp.maximum(grid, 1).astype(jnp.float32)
    coord = start[:, None] + (idx_f[None, :] + 0.5) * length[:, None] / grid_f[:, None]
    sample_mask = idx_i[None, :] < grid[:, None]                        # [n, G]
    in_range = (coord >= -1.0) & (coord <= float(size))                 # torchvision bounds
    c = jnp.maximum(coord, 0.0)                                         # if (c <= 0) c = 0
    low = jnp.floor(c).astype(jnp.int32)
    at_edge = low >= size - 1
    low = jnp.where(at_edge, size - 1, low)
    high = jnp.where(at_edge, size - 1, low + 1)
    c = jnp.where(at_edge, low.astype(jnp.float32), c)
    l = c - low.astype(jnp.float32)
    h = 1.0 - l
    mask = (in_range & sample_mask).astype(jnp.float32)
    wvec = ((h * mask)[..., None] * jax.nn.one_hot(low, size, dtype=jnp.float32) +
            (l * mask)[..., None] * jax.nn.one_hot(high, size, dtype=jnp.float32))
    return jnp.sum(wvec, axis=1)                                        # [n, size]


def _roi_align_factors(target, perm_arr, B, H, W):
    """Separable factors of aligned RoIAlign(output=1, scale=1, ratio=-1)."""
    batch = target[:, 0].astype(jnp.int32)
    # torch scales ALL coords by feature.shape[2] (= H), even for non-square
    # maps; we match that convention exactly.
    scale = float(H)
    xyxy = _xywh2xyxy(target[:, 2:6] * scale)
    x1, y1, x2, y2 = xyxy[:, 0], xyxy[:, 1], xyxy[:, 2], xyxy[:, 3]
    roi_w, roi_h = x2 - x1, y2 - y1
    grid_w = jnp.ceil(roi_w).astype(jnp.int32)   # sampling_ratio=-1 -> ceil(roi/pool)
    grid_h = jnp.ceil(roi_h).astype(jnp.int32)
    count = jnp.maximum(grid_w * grid_h, 1).astype(jnp.float32)
    mg = max(H, W) + 1                           # normalized boxes -> roi <= H
    wy = _axis_weight_sum(y1 - 0.5, roi_h, grid_h, H, mg)   # aligned=True offset
    wx = _axis_weight_sum(x1 - 0.5, roi_w, grid_w, W, mg)
    wy = wy / count[:, None]                                # fold 1/count into wy
    bone_src = jax.nn.one_hot(batch, B, dtype=jnp.float32)
    bone_swap = jax.nn.one_hot(perm_arr[batch], B, dtype=jnp.float32)
    return wy, wx, bone_src, bone_swap


def _round_up(x, m):
    return ((x + m - 1) // m) * m


def _choose_tiling(BH, WC, itemsize=2, bytes_cap=8 << 20):
    """Pick TBH, the per-step row tile over the flattened (batch, y) axis.

    Full-slab single step whenever the bf16 feature block fits an ~8 MiB
    budget (double-buffered inputs then stay far below the 32 MiB scoped-VMEM
    limit, which is safe on v7x's 64 MiB VMEM as well as v5e/v6e); otherwise
    tile in multiples of 128 rows so every block stays (8,128)-legal.
    Returns (TBH, BH_padded)."""
    bh8 = _round_up(max(BH, 8), 8)
    if bh8 * WC * itemsize <= bytes_cap:
        return bh8, bh8
    tbh = max(128, (bytes_cap // (WC * itemsize)) // 128 * 128)
    return tbh, _round_up(BH, tbh)


def _level_factors(fea, target, perm_arr, NP):
    """Per-level separable RoIAlign factors (padded to NP boxes) and the
    channels-last bf16 feature slab [B*H, W*C]."""
    B, C, H, W = fea.shape
    n = target.shape[0]
    wy, wx, bone_src, bone_swap = _roi_align_factors(target, perm_arr, B, H, W)

    pad = NP - n                   # padded rows carry zero weights
    wy = jnp.pad(wy, ((0, pad), (0, 0)))
    wx = jnp.pad(wx, ((0, pad), (0, 0)))
    bone_src = jnp.pad(bone_src, ((0, pad), (0, 0)))
    bone_swap = jnp.pad(bone_swap, ((0, pad), (0, 0)))

    # Source (key) rows stacked above domain-swapped (query) rows: only the
    # batch one-hot differs, so a single feature slab serves both.
    wy2 = jnp.concatenate([wy, wy], axis=0)                    # [2NP, H]
    wx2 = jnp.concatenate([wx, wx], axis=0)                    # [2NP, W]
    bone2 = jnp.concatenate([bone_src, bone_swap], axis=0)     # [2NP, B]

    # Row factor (batch one-hot and 1/count folded in): wyb[i, b*H + h].
    wyb = (bone2[:, :, None] * wy2[:, None, :]).reshape(2 * NP, B * H)
    # Column factor broadcast over channels: wxc[i, w*C + c] = wx[i, w].
    wxc = jnp.repeat(wx2, C, axis=1)                           # [2NP, W*C] f32

    # bf16 BEFORE the NCHW->NHWC relayout (halves that HBM round trip); the
    # stage-1 MXU matmul is bf16 with f32 accumulation.
    # TODO(synk): bf16 features/row-weights drift slightly vs torch's f32
    # RoIAlign; the accumulator and everything after stage 1 stay f32.
    f2d = jnp.transpose(fea.astype(jnp.bfloat16), (0, 2, 3, 1)).reshape(B * H, W * C)
    return wyb, f2d, wxc


@functools.partial(jax.jit, static_argnums=(2,))
def _forward_impl(features, target, perm):
    perm_arr = jnp.asarray(perm, dtype=jnp.int32)
    L = len(features)
    n = target.shape[0]
    NP = max(16, _round_up(n, 8))
    NP2 = 2 * NP

    shapes = [f.shape for f in features]                         # (B, C, H, W)
    WC_max = _round_up(max(C * W for (_, C, _, W) in shapes), 128)
    C_max = max(C for (_, C, _, _) in shapes)
    BH_raw = max(B * H for (B, _, H, _) in shapes)
    TBH, BH_pad = _choose_tiling(BH_raw, WC_max)
    num_k = BH_pad // TBH

    # Pad every level to the common [BH_pad, WC_max] slab (zero padding is
    # inert: padded rows/lanes have zero pooling weight) and stack over levels.
    wyb_l, f_l, wxc_l, sel_l = [], [], [], []
    for fea in features:
        B, C, H, W = fea.shape
        wyb, f2d, wxc = _level_factors(fea, target, perm_arr, NP)
        wyb_l.append(jnp.pad(wyb, ((0, 0), (0, BH_pad - B * H))).astype(jnp.bfloat16))
        f_l.append(jnp.pad(f2d, ((0, BH_pad - B * H), (0, WC_max - W * C))))
        wxc_l.append(jnp.pad(wxc, ((0, 0), (0, WC_max - W * C))))
        # Per-level selection matrix Sel[w*C + c, c'] = (c == c'): turns the
        # grouped lane-sum over w into one tiny matmul, so the kernel body is
        # shape-uniform across levels despite different (W, C) splits.
        cidx = jnp.tile(jnp.arange(C, dtype=jnp.int32), W)
        sel = jax.nn.one_hot(cidx, C_max, dtype=jnp.float32)
        sel_l.append(jnp.pad(sel, ((0, WC_max - W * C), (0, 0))))
    wyb_s = jnp.stack(wyb_l)      # [L, 2NP, BH_pad]   bf16
    f_s = jnp.stack(f_l)          # [L, BH_pad, WC_max] bf16
    wxc_s = jnp.stack(wxc_l)      # [L, 2NP, WC_max]   f32
    sel_s = jnp.stack(sel_l)      # [L, WC_max, C_max] f32

    kernel = _make_fused_kernel(n, NP, num_k)
    # One fused launch; leading level axis is "parallel" (second TC on v7x),
    # the B*H reduction axis is "arbitrary" (resident f32 accumulator).
    losses = pl.pallas_call(
        kernel,
        out_shape=jax.ShapeDtypeStruct((L, 1, 1), jnp.float32),
        grid_spec=pltpu.PrefetchScalarGridSpec(
            num_scalar_prefetch=0,
            grid=(L, num_k),
            in_specs=[
                pl.BlockSpec((None, NP2, TBH), lambda l, k: (l, 0, k)),      # wyb
                pl.BlockSpec((None, TBH, WC_max), lambda l, k: (l, k, 0)),   # features
                pl.BlockSpec((None, NP2, WC_max), lambda l, k: (l, 0, 0)),   # wxc (resident)
                pl.BlockSpec((None, WC_max, C_max), lambda l, k: (l, 0, 0)),  # Sel (resident)
            ],
            out_specs=pl.BlockSpec((None, 1, 1), lambda l, k: (l, 0, 0)),
            scratch_shapes=[
                pltpu.VMEM((NP2, WC_max), jnp.float32),   # stage-1 accumulator
            ],
        ),
        compiler_params=pltpu.CompilerParams(
            dimension_semantics=("parallel", "arbitrary"),
            vmem_limit_bytes=32 * 1024 * 1024,   # explicit, v7x-safe budget
        ),
    )(wyb_s, f_s, wxc_s, sel_s)
    return jnp.sum(losses) / L


def one_to_one_inst_layer_forward(feature, target, domainlables):
    """forwardWithContro: aligned 1x1 RoIAlign on source + domain-swapped
    features, L2-normalize, per-level NCE loss, averaged over levels."""
    if not isinstance(domainlables, list):
        return None
    feaN = feature[0].shape[0]
    feaNlist = list(range(feaN))
    for i, lable in enumerate(domainlables):
        if lable == 3:
            assert lable == 3 and domainlables[i - 1] == 0
            feaNlist[i - 1], feaNlist[i] = feaNlist[i], feaNlist[i - 1]
    n = target.shape[0]
    if n == 0:
        return jnp.float32(0.0)
    return _forward_impl(tuple(feature), target, tuple(feaNlist))


# ----------------------------- demo / smoke test ----------------------------
if __name__ == "__main__":
    key = jax.random.PRNGKey(0)
    k1, k2, k3, k4, k5 = jax.random.split(key, 5)
    B = 2
    # three pyramid levels (NCHW), like YOLO P3/P4/P5 heads at small sizes
    feature = [
        jax.random.normal(k1, (B, 8, 64, 64), dtype=jnp.float32),
        jax.random.normal(k2, (B, 16, 32, 32), dtype=jnp.float32),
        jax.random.normal(k3, (B, 32, 16, 16), dtype=jnp.float32),
    ]
    # targets: [img_idx, class, cx, cy, w, h] (normalized xywh)
    n_box = 6
    img_idx = jax.random.randint(k4, (n_box, 1), 0, B).astype(jnp.float32)
    cls = jnp.zeros((n_box, 1), dtype=jnp.float32)
    kxy, kwh = jax.random.split(k5)
    cxcy = jax.random.uniform(kxy, (n_box, 2), minval=0.3, maxval=0.7)
    wh = jax.random.uniform(kwh, (n_box, 2), minval=0.1, maxval=0.4)
    target = jnp.concatenate([img_idx, cls, cxcy, wh], axis=1)
    domainlables = [0, 3]   # (source, assist) pair -> swap batch items 0 and 1

    loss = one_to_one_inst_layer_forward(feature, target, domainlables)
    jax.block_until_ready(loss)
    assert bool(jnp.isfinite(loss))
    print("KERNEL_OK")
</pallas_src>

<mosaic_0001>
module attributes {stable_mosaic.version = 11 : i64} {
  func.func @kernel(%arg0: i32, %arg1: i32, %arg2: memref<1x32x128xbf16, #tpu.memory_space<vmem>>, %arg3: memref<1x128x512xbf16, #tpu.memory_space<vmem>>, %arg4: memref<1x32x512xf32, #tpu.memory_space<vmem>>, %arg5: memref<1x512x32xf32, #tpu.memory_space<vmem>>, %arg6: memref<1x1x1xf32, #tpu.memory_space<vmem>>, %arg7: memref<32x512xf32, #tpu.memory_space<vmem>>) attributes {dimension_semantics = [#tpu.dimension_semantics<parallel>, #tpu.dimension_semantics<arbitrary>], iteration_bounds = array<i64: 3, 1>, scalar_prefetch = 0 : i64, scratch_operands = 1 : i64, tpu.core_type = #tpu.core_type<tc>, window_params = [{transform_indices = @transform_0, window_bounds = array<i64: 1, 32, 128>}, {transform_indices = @transform_1, window_bounds = array<i64: 1, 128, 512>}, {transform_indices = @transform_2, window_bounds = array<i64: 1, 32, 512>}, {transform_indices = @transform_3, window_bounds = array<i64: 1, 512, 32>}, {transform_indices = @transform_4, window_bounds = array<i64: 1, 1, 1>}]} {
    %c0_i32 = arith.constant 0 : i32
    %0 = arith.cmpi eq, %arg1, %c0_i32 : i32
    %1 = arith.extui %0 : i1 to i32
    %c0_i32_0 = arith.constant 0 : i32
    %2 = arith.cmpi ne, %1, %c0_i32_0 : i32
    scf.if %2 {
      %cst_12 = arith.constant 0.000000e+00 : f32
      %14 = vector.broadcast %cst_12 : f32 to vector<32x512xf32>
      %c0_13 = arith.constant 0 : index
      %c0_14 = arith.constant 0 : index
      %15 = vector.load %arg7[%c0_13, %c0_14] : memref<32x512xf32, #tpu.memory_space<vmem>>, vector<32x512xf32>
      tpu.vector_store %arg7[%c0_13, %c0_14], %14 {strides = array<i32>} : memref<32x512xf32, #tpu.memory_space<vmem>>, vector<32x512xf32>,
    } else {
    }
    %c0 = arith.constant 0 : index
    %c0_1 = arith.constant 0 : index
    %3 = vector.load %arg7[%c0, %c0_1] : memref<32x512xf32, #tpu.memory_space<vmem>>, vector<32x512xf32>
    %c0_2 = arith.constant 0 : index
    %c0_3 = arith.constant 0 : index
    %c0_4 = arith.constant 0 : index
    %4 = vector.load %arg2[%c0_2, %c0_3, %c0_4] : memref<1x32x128xbf16, #tpu.memory_space<vmem>>, vector<1x32x128xbf16>
    %5 = vector.shape_cast %4 : vector<1x32x128xbf16> to vector<32x128xbf16>
    %c0_5 = arith.constant 0 : index
    %c0_6 = arith.constant 0 : index
    %c0_7 = arith.constant 0 : index
    %6 = vector.load %arg3[%c0_5, %c0_6, %c0_7] : memref<1x128x512xbf16, #tpu.memory_space<vmem>>, vector<1x128x512xbf16>
    %7 = vector.shape_cast %6 : vector<1x128x512xbf16> to vector<128x512xbf16>
    %cst = arith.constant dense<0.000000e+00> : vector<32x512xf32>
    %8 = tpu.matmul %5, %7, %cst {dimension_numbers = #tpu.dot_dimension_numbers<[1], [0], [0], [1], [0, 0, 1, 1], [], []>} : vector<32x128xbf16>, vector<128x512xbf16>, vector<32x512xf32> -> vector<32x512xf32>
    %9 = arith.addf %3, %8 : vector<32x512xf32>
    %c0_8 = arith.constant 0 : index
    %c0_9 = arith.constant 0 : index
    %10 = vector.load %arg7[%c0_8, %c0_9] : memref<32x512xf32, #tpu.memory_space<vmem>>, vector<32x512xf32>
    tpu.vector_store %arg7[%c0_8, %c0_9], %9 {strides = array<i32>} : memref<32x512xf32, #tpu.memory_space<vmem>>, vector<32x512xf32>,
    %c0_i32_10 = arith.constant 0 : i32
    %11 = arith.cmpi eq, %arg1, %c0_i32_10 : i32
    %12 = arith.extui %11 : i1 to i32
    %c0_i32_11 = arith.constant 0 : i32
    %13 = arith.cmpi ne, %12, %c0_i32_11 : i32
    scf.if %13 {
      %c0_12 = arith.constant 0 : index
      %c0_13 = arith.constant 0 : index
      %14 = vector.load %arg7[%c0_12, %c0_13] : memref<32x512xf32, #tpu.memory_space<vmem>>, vector<32x512xf32>
      %c0_14 = arith.constant 0 : index
      %c0_15 = arith.constant 0 : index
      %c0_16 = arith.constant 0 : index
      %15 = vector.load %arg4[%c0_14, %c0_15, %c0_16] : memref<1x32x512xf32, #tpu.memory_space<vmem>>, vector<1x32x512xf32>
      %16 = vector.shape_cast %15 : vector<1x32x512xf32> to vector<32x512xf32>
      %17 = arith.mulf %14, %16 : vector<32x512xf32>
      %c0_17 = arith.constant 0 : index
      %c0_18 = arith.constant 0 : index
      %c0_19 = arith.constant 0 : index
      %18 = vector.load %arg5[%c0_17, %c0_18, %c0_19] : memref<1x512x32xf32, #tpu.memory_space<vmem>>, vector<1x512x32xf32>
      %19 = vector.shape_cast %18 : vector<1x512x32xf32> to vector<512x32xf32>
      %cst_20 = arith.constant dense<0.000000e+00> : vector<32x32xf32>
      %20 = tpu.matmul %17, %19, %cst_20 {dimension_numbers = #tpu.dot_dimension_numbers<[1], [0], [0], [1], [0, 0, 1, 1], [], []>} : vector<32x512xf32>, vector<512x32xf32>, vector<32x32xf32> -> vector<32x32xf32>
      %21 = vector.extract_strided_slice %20 {offsets = [0, 0], sizes = [16, 32], strides = [1, 1]} : vector<32x32xf32> to vector<16x32xf32>
      %22 = vector.extract_strided_slice %20 {offsets = [16, 0], sizes = [16, 32], strides = [1, 1]} : vector<32x32xf32> to vector<16x32xf32>
      %23 = arith.mulf %21, %21 : vector<16x32xf32>
      %cst_21 = arith.constant dense<0.000000e+00> : vector<16xf32>
      %24 = vector.multi_reduction <add>, %23, %cst_21 [1] : vector<16x32xf32> to vector<16xf32>
      %25 = vector.shape_cast %24 : vector<16xf32> to vector<16x1xf32>
      %26 = math.sqrt %25 : vector<16x1xf32>
      %cst_22 = arith.constant 1.000000e-07 : f32
      %27 = vector.broadcast %cst_22 : f32 to vector<16x1xf32>
      %28 = arith.addf %26, %27 : vector<16x1xf32>
      %29 = tpu.reciprocal %28 {approx = true} : vector<16x1xf32> -> vector<16x1xf32>
      %30 = vector.broadcast %29 : vector<16x1xf32> to vector<16x32xf32>
      %31 = arith.mulf %21, %30 : vector<16x32xf32>
      %32 = arith.mulf %22, %22 : vector<16x32xf32>
      %cst_23 = arith.constant dense<0.000000e+00> : vector<16xf32>
      %33 = vector.multi_reduction <add>, %32, %cst_23 [1] : vector<16x32xf32> to vector<16xf32>
      %34 = vector.shape_cast %33 : vector<16xf32> to vector<16x1xf32>
      %35 = math.sqrt %34 : vector<16x1xf32>
      %cst_24 = arith.constant 1.000000e-07 : f32
      %36 = vector.broadcast %cst_24 : f32 to vector<16x1xf32>
      %37 = arith.addf %35, %36 : vector<16x1xf32>
      %38 = tpu.reciprocal %37 {approx = true} : vector<16x1xf32> -> vector<16x1xf32>
      %39 = vector.broadcast %38 : vector<16x1xf32> to vector<16x32xf32>
      %40 = arith.mulf %22, %39 : vector<16x32xf32>
      %41 = arith.mulf %40, %31 : vector<16x32xf32>
      %cst_25 = arith.constant dense<0.000000e+00> : vector<16xf32>
      %42 = vector.multi_reduction <add>, %41, %cst_25 [1] : vector<16x32xf32> to vector<16xf32>
      %43 = vector.shape_cast %42 : vector<16xf32> to vector<16x1xf32>
      %cst_26 = arith.constant dense<0.000000e+00> : vector<16x16xf32>
      %44 = tpu.matmul %40, %31, %cst_26 {dimension_numbers = #tpu.dot_dimension_numbers<[1], [1], [0], [0], [0, 0, 1, 0], [], []>} : vector<16x32xf32>, vector<16x32xf32>, vector<16x16xf32> -> vector<16x16xf32>
      %45 = tpu.iota {dimensions = array<i32: 0>} : vector<16x16xi32>
      %46 = tpu.iota {dimensions = array<i32: 1>} : vector<16x16xi32>
      %47 = arith.cmpi eq, %45, %46 : vector<16x16xi32>
      %cst_27 = arith.constant -1.000000e+01 : f32
      %48 = vector.broadcast %cst_27 : f32 to vector<16x16xf32>
      %49 = arith.select %47, %48, %44 : vector<16x16xi1>, vector<16x16xf32>
      %c6_i32 = arith.constant 6 : i32
      %50 = vector.broadcast %c6_i32 : i32 to vector<16x16xi32>
      %51 = arith.cmpi slt, %46, %50 : vector<16x16xi32>
      %cst_28 = arith.constant -1.000000e+09 : f32
      %52 = vector.broadcast %cst_28 : f32 to vector<16x16xf32>
      %53 = arith.select %51, %49, %52 : vector<16x16xi1>, vector<16x16xf32>
      %cst_29 = arith.constant 14.2857141 : f32
      %54 = vector.broadcast %cst_29 : f32 to vector<16x1xf32>
      %55 = arith.mulf %43, %54 : vector<16x1xf32>
      %cst_30 = arith.constant 14.2857141 : f32
      %56 = vector.broadcast %cst_30 : f32 to vector<16x16xf32>
      %57 = arith.mulf %53, %56 : vector<16x16xf32>
      %cst_31 = arith.constant dense<0xFF800000> : vector<16xf32>
      %58 = vector.multi_reduction <maximumf>, %57, %cst_31 [1] : vector<16x16xf32> to vector<16xf32>
      %59 = vector.shape_cast %58 : vector<16xf32> to vector<16x1xf32>
      %60 = arith.maximumf %59, %55 : vector<16x1xf32>
      %61 = arith.subf %55, %60 : vector<16x1xf32>
      %62 = math.exp %61 : vector<16x1xf32>
      %63 = vector.broadcast %60 : vector<16x1xf32> to vector<16x16xf32>
      %64 = arith.subf %57, %63 : vector<16x16xf32>
      %65 = math.exp %64 : vector<16x16xf32>
      %cst_32 = arith.constant dense<0.000000e+00> : vector<16xf32>
      %66 = vector.multi_reduction <add>, %65, %cst_32 [1] : vector<16x16xf32> to vector<16xf32>
      %67 = vector.shape_cast %66 : vector<16xf32> to vector<16x1xf32>
      %68 = arith.addf %62, %67 : vector<16x1xf32>
      %69 = math.log %68 : vector<16x1xf32>
      %70 = arith.addf %60, %69 : vector<16x1xf32>
      %71 = arith.subf %70, %55 : vector<16x1xf32>
      %72 = tpu.iota {dimensions = array<i32: 0>} : vector<16x1xi32>
      %c6_i32_33 = arith.constant 6 : i32
      %73 = vector.broadcast %c6_i32_33 : i32 to vector<16x1xi32>
      %74 = arith.cmpi slt, %72, %73 : vector<16x1xi32>
      %cst_34 = arith.constant 0.000000e+00 : f32
      %75 = vector.broadcast %cst_34 : f32 to vector<16x1xf32>
      %76 = arith.select %74, %71, %75 : vector<16x1xi1>, vector<16x1xf32>
      %cst_35 = arith.constant dense<0.000000e+00> : vector<1xf32>
      %77 = vector.multi_reduction <add>, %76, %cst_35 [0] : vector<16x1xf32> to vector<1xf32>
      %78 = vector.shape_cast %77 : vector<1xf32> to vector<1x1xf32>
      %cst_36 = arith.constant 0.166666672 : f32
      %79 = vector.broadcast %cst_36 : f32 to vector<1x1xf32>
      %80 = arith.mulf %78, %79 : vector<1x1xf32>
      %c0_37 = arith.constant 0 : index
      %c0_38 = arith.constant 0 : index
      %c0_39 = arith.constant 0 : index
      %81 = vector.load %arg6[%c0_37, %c0_38, %c0_39] : memref<1x1x1xf32, #tpu.memory_space<vmem>>, vector<1x1x1xf32>
      %82 = vector.shape_cast %81 : vector<1x1x1xf32> to vector<1x1xf32>
      %83 = vector.shape_cast %80 : vector<1x1xf32> to vector<1x1x1xf32>
      tpu.vector_store %arg6[%c0_37, %c0_38, %c0_39], %83 {strides = array<i32>} : memref<1x1x1xf32, #tpu.memory_space<vmem>>, vector<1x1x1xf32>,
    } else {
    }
    return
  }
  func.func @transform_0(%arg0: i32, %arg1: i32) -> (i32, i32, i32) {
    %c0_i32 = arith.constant 0 : i32
    %c0_i32_0 = arith.constant 0 : i32
    return %arg0, %c0_i32, %arg1 : i32, i32, i32
  }
  func.func @transform_1(%arg0: i32, %arg1: i32) -> (i32, i32, i32) {
    %c0_i32 = arith.constant 0 : i32
    %c0_i32_0 = arith.constant 0 : i32
    return %arg0, %arg1, %c0_i32 : i32, i32, i32
  }
  func.func @transform_2(%arg0: i32, %arg1: i32) -> (i32, i32, i32) {
    %c0_i32 = arith.constant 0 : i32
    %c0_i32_0 = arith.constant 0 : i32
    %c0_i32_1 = arith.constant 0 : i32
    return %arg0, %c0_i32, %c0_i32_0 : i32, i32, i32
  }
  func.func @transform_3(%arg0: i32, %arg1: i32) -> (i32, i32, i32) {
    %c0_i32 = arith.constant 0 : i32
    %c0_i32_0 = arith.constant 0 : i32
    %c0_i32_1 = arith.constant 0 : i32
    return %arg0, %c0_i32, %c0_i32_0 : i32, i32, i32
  }
  func.func @transform_4(%arg0: i32, %arg1: i32) -> (i32, i32, i32) {
    %c0_i32 = arith.constant 0 : i32
    %c0_i32_0 = arith.constant 0 : i32
    %c0_i32_1 = arith.constant 0 : i32
    return %arg0, %c0_i32, %c0_i32_0 : i32, i32, i32
  }
}

</mosaic_0001>

<bundles_post_ra>
// kernel: _forward_impl.1
= control target key start
LH: loop header
LB: loop body
LE: loop exit
PB: predicated region body
PF: predicated region fallthrough
CT: control target
= control target key end

     0   :  { %s1462_s15 = smov 0   ;;  %s1464_s16 = smov 0   ;;  %s1696_s0 = inlined_call_operand.vmem [shape: bf16[3,32,128], index: 0, kind: input, shape index: {}]   ;;  %s1697_s1 = inlined_call_operand.vmem [shape: bf16[3,128,512], index: 1, kind: input, shape index: {}]   ;;  %s1698_s2 = inlined_call_operand.vmem [shape: f32[3,32,512], index: 2, kind: input, shape index: {}]   ;;  %s1699_s3 = inlined_call_operand.vmem [shape: f32[3,512,32], index: 3, kind: input, shape index: {}]   ;;  %s1700_s4 = inlined_call_operand.vmem [shape: f32[3,1,1], index: 4, kind: output, shape index: {}]  }
   0x1   :  { %s1466_s17 = smov 0  }
   0x2 LB: > { %s26_s18 = sadd.s32 1, %s1431_s16  ;;  %p1176_p0 = scmp.ge.s32.totalorder %s1435_s17, 1  ;;  %s1435_s17 = sphi %s1466_s17, %s14_s17   ;;  %s1431_s16 = sphi %s1464_s16, %s1702_s16   ;;  %s1427_s15 = sphi %s1462_s15, %s1701_s15  }
   0x3   : > { %p28_p1 = scmp.ge.s32.totalorder %s26_s18, 3  ;;  %p217_p2 = scmp.lt.s32.totalorder %s1435_s17, 4 }
   0x5   : > { %s1704_s18 = smov (%p28_p1, %s26_s18), 0  ;;  %p218_p3 = pnand %p1176_p0, %p217_p2 }
   0x6   : > { %p264_p4 = scmp.lt.s32.totalorder (!%p218_p3), %s1427_s15, 2 }
   0x7   : > { %221 = sbr.rel (%p218_p3) target bundleno = 897 (0x381), region = 36 }
   0xc   : > { %s1706_s15 = smov (!%p264_p4, %s1427_s15), 2  ;;  %vm881_vm0 = vcmask 261120   ;;  %vm1015_vm11 = vcmask 130048   ;;  %vm1064_vm13 = vcmask 0  }
   0xd   : > { %s1328_s19 = sshll.u32 %s1706_s15, 8  ;;  %s1327_s23 = sshll.u32 %s1706_s15, 4 }
   0xe   : > { %s1486_s22 = scalar_lea.vmem %s1697_s1, %s1328_s19  ;;  %s1330_s24 = sshll.u32 %s1706_s15, 9 }
   0xf   : > { %v1315_v0 = vld [vmem:[%s1486_s22 + $0xe8] sm:$0xf]  ;;  %v1364_v1 = vld [vmem:[%s1486_s22 + $0xf4] sm:$0xf0]  ;;  %v1362_v2 = vld [vmem:[%s1486_s22 + $0xec] sm:$0xf]  ;;  %s1557_s27 = scalar_lea.vmem %s1696_s0, %s1327_s23  ;;  %s1562_s30 = scalar_lea.vmem %s1699_s3, %s1330_s24 }
  0x10   : > { %v1316_v3 = vor.u32 %v1364_v1, %v1315_v0  ;;  %v1317_v4 = vld [vmem:[%s1486_s22 + $0xf8] sm:$0xf0]  ;;  %v1307_v5 = vld [vmem:[%s1486_s22 + $0xe0] sm:$0xf]  ;;  %v1363_v6 = vld [vmem:[%s1486_s22 + $0xec] sm:$0xf0]  ;;  %s295_s11 = scalar_lea.vmem %s1700_s4, %s1706_s15 }
  0x11   : > { %v1320_v7 = vor.u32 %v1362_v2, %v1317_v4  ;;  %v1308_v8 = vor.u32 %v1363_v6, %v1307_v5  ;;  %v1361_v9 = vld [vmem:[%s1486_s22 + $0xe4] sm:$0xf]  ;;  %v1309_v10 = vld [vmem:[%s1486_s22 + $0xf0] sm:$0xf0]  ;;  %v1299_v11 = vld [vmem:[%s1486_s22 + $0xc8] sm:$0xf] }
  0x12   : > { %578 = vmatpush.bf16.msra.mxu2 %v1316_v3  ;;  %v1312_v12 = vor.u32 %v1361_v9, %v1309_v10  ;;  %v1360_v13 = vld [vmem:[%s1486_s22 + $0xd4] sm:$0xf0]  ;;  %v1358_v14 = vld [vmem:[%s1486_s22 + $0xcc] sm:$0xf]  ;;  %v1301_v15 = vld [vmem:[%s1486_s22 + $0xd8] sm:$0xf0] }
  0x13   : > { %597 = vmatpush.bf16.msra.mxu3 %v1320_v7  ;;  %540 = vmatpush.bf16.msra.mxu0 %v1308_v8  ;;  %v1300_v16 = vor.u32 %v1360_v13, %v1299_v11  ;;  %v1304_v17 = vor.u32 %v1358_v14, %v1301_v15  ;;  %v1291_v18 = vld [vmem:[%s1486_s22 + $0xc0] sm:$0xf]  ;;  %v1359_v19 = vld [vmem:[%s1486_s22 + $0xcc] sm:$0xf0]  ;;  %v1357_v20 = vld [vmem:[%s1486_s22 + $0xc4] sm:$0xf] }
  0x14   : > { %559 = vmatpush.bf16.msra.mxu1 %v1312_v12  ;;  %v1292_v21 = vor.u32 %v1359_v19, %v1291_v18  ;;  %v1293_v22 = vld [vmem:[%s1486_s22 + $0xd0] sm:$0xf0]  ;;  %v1283_v23 = vld [vmem:[%s1486_s22 + $0xa8] sm:$0xf]  ;;  %v1356_v24 = vld [vmem:[%s1486_s22 + $0xb4] sm:$0xf0] }
  0x15   : > { %v1296_v25 = vor.u32 %v1357_v20, %v1293_v22  ;;  %v1354_v26 = vld [vmem:[%s1486_s22 + $0xac] sm:$0xf]  ;;  %v1285_v27 = vld [vmem:[%s1486_s22 + $0xb8] sm:$0xf0]  ;;  %v1275_v28 = vld [vmem:[%s1486_s22 + $0xa0] sm:$0xf]  ;;  %v1284_v29 = vor.u32 %v1356_v24, %v1283_v23 }
  0x16   : > { %579 = vmatpush.bf16.msra.mxu2 %v1300_v16  ;;  %v1355_v30 = vld [vmem:[%s1486_s22 + $0xac] sm:$0xf0]  ;;  %v1353_v31 = vld [vmem:[%s1486_s22 + $0xa4] sm:$0xf]  ;;  %v1277_v32 = vld [vmem:[%s1486_s22 + $0xb0] sm:$0xf0]  ;;  %v1288_v33 = vor.u32 %v1354_v26, %v1285_v27 }
  0x17   : > { %598 = vmatpush.bf16.msra.mxu3 %v1304_v17  ;;  %541 = vmatpush.bf16.msra.mxu0 %v1292_v21  ;;  %v1276_v34 = vor.u32 %v1355_v30, %v1275_v28  ;;  %v1267_v35 = vld [vmem:[%s1486_s22 + $0x88] sm:$0xf]  ;;  %v1352_v36 = vld [vmem:[%s1486_s22 + $0x94] sm:$0xf0]  ;;  %v1350_v37 = vld [vmem:[%s1486_s22 + $0x8c] sm:$0xf]  ;;  %v1280_v38 = vor.u32 %v1353_v31, %v1277_v32 }
  0x18   : > { %560 = vmatpush.bf16.msra.mxu1 %v1296_v25  ;;  %v1269_v39 = vld [vmem:[%s1486_s22 + $0x98] sm:$0xf0]  ;;  %v1259_v40 = vld [vmem:[%s1486_s22 + $0x80] sm:$0xf]  ;;  %v1351_v41 = vld [vmem:[%s1486_s22 + $0x8c] sm:$0xf0]  ;;  %v1268_v44 = vor.u32 %v1352_v36, %v1267_v35 }
  0x19   : > { %v1349_v42 = vld [vmem:[%s1486_s22 + $0x84] sm:$0xf]  ;;  %v1261_v43 = vld [vmem:[%s1486_s22 + $0x90] sm:$0xf0]  ;;  %v1272_v45 = vor.u32 %v1350_v37, %v1269_v39  ;;  %v1260_v46 = vor.u32 %v1351_v41, %v1259_v40  ;;  %v1251_v47 = vld [vmem:[%s1486_s22 + $0x68] sm:$0xf] }
  0x1a   : > { %580 = vmatpush.bf16.msra.mxu2 %v1284_v29  ;;  %v1348_v48 = vld [vmem:[%s1486_s22 + $0x74] sm:$0xf0]  ;;  %v1346_v49 = vld [vmem:[%s1486_s22 + $0x6c] sm:$0xf]  ;;  %v1264_v50 = vor.u32 %v1349_v42, %v1261_v43  ;;  %v1253_v51 = vld [vmem:[%s1486_s22 + $0x78] sm:$0xf0] }
  0x1b   : > { %599 = vmatpush.bf16.msra.mxu3 %v1288_v33  ;;  %542 = vmatpush.bf16.msra.mxu0 %v1276_v34  ;;  %v1243_v52 = vld [vmem:[%s1486_s22 + $0x60] sm:$0xf]  ;;  %v1347_v53 = vld [vmem:[%s1486_s22 + $0x6c] sm:$0xf0]  ;;  %v1345_v54 = vld [vmem:[%s1486_s22 + $0x64] sm:$0xf]  ;;  %v1252_v56 = vor.u32 %v1348_v48, %v1251_v47  ;;  %v1256_v57 = vor.u32 %v1346_v49, %v1253_v51 }
  0x1c   : > { %561 = vmatpush.bf16.msra.mxu1 %v1280_v38  ;;  %v1245_v55 = vld [vmem:[%s1486_s22 + $0x70] sm:$0xf0]  ;;  %v1244_v58 = vor.u32 %v1347_v53, %v1243_v52  ;;  %v1235_v59 = vld [vmem:[%s1486_s22 + $0x48] sm:$0xf]  ;;  %v1344_v60 = vld [vmem:[%s1486_s22 + $0x54] sm:$0xf0] }
  0x1d   : > { %v1342_v61 = vld [vmem:[%s1486_s22 + $0x4c] sm:$0xf]  ;;  %v1248_v62 = vor.u32 %v1345_v54, %v1245_v55  ;;  %v1237_v63 = vld [vmem:[%s1486_s22 + $0x58] sm:$0xf0]  ;;  %v1227_v0 = vld [vmem:[%s1486_s22 + $0x40] sm:$0xf]  ;;  %v1236_v4 = vor.u32 %v1344_v60, %v1235_v59 }
  0x1e   : > { %581 = vmatpush.bf16.msra.mxu2 %v1268_v44  ;;  %v1343_v1 = vld [vmem:[%s1486_s22 + $0x4c] sm:$0xf0]  ;;  %v1341_v2 = vld [vmem:[%s1486_s22 + $0x44] sm:$0xf]  ;;  %v1229_v3 = vld [vmem:[%s1486_s22 + $0x50] sm:$0xf0]  ;;  %v1240_v5 = vor.u32 %v1342_v61, %v1237_v63 }
  0x1f   : > { %600 = vmatpush.bf16.msra.mxu3 %v1272_v45  ;;  %543 = vmatpush.bf16.msra.mxu0 %v1260_v46  ;;  %v1228_v6 = vor.u32 %v1343_v1, %v1227_v0  ;;  %v1219_v7 = vld [vmem:[%s1486_s22 + $0x28] sm:$0xf]  ;;  %v1340_v8 = vld [vmem:[%s1486_s22 + $0x34] sm:$0xf0]  ;;  %v1338_v9 = vld [vmem:[%s1486_s22 + $0x2c] sm:$0xf]  ;;  %v1232_v10 = vor.u32 %v1341_v2, %v1229_v3 }
  0x20   : > { %562 = vmatpush.bf16.msra.mxu1 %v1264_v50  ;;  %v1221_v11 = vld [vmem:[%s1486_s22 + $0x38] sm:$0xf0]  ;;  %v1211_v12 = vld [vmem:[%s1486_s22 + $0x20] sm:$0xf]  ;;  %v1339_v13 = vld [vmem:[%s1486_s22 + $0x2c] sm:$0xf0]  ;;  %v1220_v16 = vor.u32 %v1340_v8, %v1219_v7 }
  0x21   : > { %v1337_v14 = vld [vmem:[%s1486_s22 + $0x24] sm:$0xf]  ;;  %v1213_v15 = vld [vmem:[%s1486_s22 + $0x30] sm:$0xf0]  ;;  %v1203_v17 = vld [vmem:[%s1486_s22 + $0x8] sm:$0xf]  ;;  %v1224_v18 = vor.u32 %v1338_v9, %v1221_v11  ;;  %v1212_v19 = vor.u32 %v1339_v13, %v1211_v12 }
  0x22   : > { %582 = vmatpush.bf16.msra.mxu2 %v1252_v56  ;;  %v1336_v20 = vld [vmem:[%s1486_s22 + $0x14] sm:$0xf0]  ;;  %v1334_v21 = vld [vmem:[%s1486_s22 + $0xc] sm:$0xf]  ;;  %v1216_v22 = vor.u32 %v1337_v14, %v1213_v15  ;;  %v1205_v23 = vld [vmem:[%s1486_s22 + $0x18] sm:$0xf0] }
  0x23   : > { %601 = vmatpush.bf16.msra.mxu3 %v1256_v57  ;;  %544 = vmatpush.bf16.msra.mxu0 %v1244_v58  ;;  %v1195_v24 = vld [vmem:[%s1486_s22] sm:$0xf]  ;;  %v1335_v25 = vld [vmem:[%s1486_s22 + $0xc] sm:$0xf0]  ;;  %v1333_v26 = vld [vmem:[%s1486_s22 + $0x4] sm:$0xf]  ;;  %v1204_v28 = vor.u32 %v1336_v20, %v1203_v17  ;;  %v1208_v29 = vor.u32 %v1334_v21, %v1205_v23 }
  0x24   : > { %563 = vmatpush.bf16.msra.mxu1 %v1248_v62  ;;  %v1197_v27 = vld [vmem:[%s1486_s22 + $0x10] sm:$0xf0]  ;;  %v1196_v30 = vor.u32 %v1335_v25, %v1195_v24  ;;  %v1331_v32 = vld [vmem:[%s1557_s27] sm:$0xff]  ;;  %v714_v33 = vld [vmem:[%s1562_s30 + $0x78] sm:$0xff]  ;;  %s1329_s5 = sshll.u32 %s1706_s15, 7 }
  0x25   : > { %v1200_v31 = vor.u32 %v1333_v26, %v1197_v27  ;;  %v730_v34 = vld [vmem:[%s1562_s30 + $0xf8] sm:$0xff]  ;;  %v713_v35 = vld [vmem:[%s1562_s30 + $0x70] sm:$0xff]  ;;  %v712_v38 = vld [vmem:[%s1562_s30 + $0x68] sm:$0xff]  ;;  %s1634_s8 = scalar_lea.vmem %s1698_s2, %s1329_s5 }
  0x26   : > { %583 = vmatpush.bf16.msra.mxu2 %v1236_v4  ;;  %v729_v36 = vld [vmem:[%s1562_s30 + $0xf0] sm:$0xff]  ;;  %v746_v37 = vld [vmem:[%s1562_s30 + $0x178] sm:$0xff]  ;;  %v728_v40 = vld [vmem:[%s1562_s30 + $0xe8] sm:$0xff] }
  0x27   : > { %602 = vmatpush.bf16.msra.mxu3 %v1240_v5  ;;  %545 = vmatpush.bf16.msra.mxu0 %v1228_v6  ;;  %v762_v39 = vld [vmem:[%s1562_s30 + $0x1f8] sm:$0xff]  ;;  %v745_v41 = vld [vmem:[%s1562_s30 + $0x170] sm:$0xff]  ;;  %v711_v42 = vld [vmem:[%s1562_s30 + $0x60] sm:$0xff] }
  0x28   : > { %564 = vmatpush.bf16.msra.mxu1 %v1232_v10  ;;  %v761_v43 = vld [vmem:[%s1562_s30 + $0x1f0] sm:$0xff]  ;;  %v727_v44 = vld [vmem:[%s1562_s30 + $0xe0] sm:$0xff]  ;;  %v744_v45 = vld [vmem:[%s1562_s30 + $0x168] sm:$0xff] }
  0x29   : > { %v710_v46 = vld [vmem:[%s1562_s30 + $0x58] sm:$0xff]  ;;  %v760_v47 = vld [vmem:[%s1562_s30 + $0x1e8] sm:$0xff]  ;;  %v743_v49 = vld [vmem:[%s1562_s30 + $0x160] sm:$0xff] }
  0x2a   : > { %584 = vmatpush.bf16.msra.mxu2 %v1220_v16  ;;  %v726_v48 = vld [vmem:[%s1562_s30 + $0xd8] sm:$0xff]  ;;  %v709_v50 = vld [vmem:[%s1562_s30 + $0x50] sm:$0xff]  ;;  %v759_v51 = vld [vmem:[%s1562_s30 + $0x1e0] sm:$0xff] }
  0x2b   : > { %603 = vmatpush.bf16.msra.mxu3 %v1224_v18  ;;  %546 = vmatpush.bf16.msra.mxu0 %v1212_v19  ;;  %v725_v52 = vld [vmem:[%s1562_s30 + $0xd0] sm:$0xff]  ;;  %v742_v53 = vld [vmem:[%s1562_s30 + $0x158] sm:$0xff]  ;;  %v708_v54 = vld [vmem:[%s1562_s30 + $0x48] sm:$0xff] }
  0x2c   : > { %565 = vmatpush.bf16.msra.mxu1 %v1216_v22  ;;  %v758_v55 = vld [vmem:[%s1562_s30 + $0x1d8] sm:$0xff]  ;;  %v724_v56 = vld [vmem:[%s1562_s30 + $0xc8] sm:$0xff]  ;;  %v741_v57 = vld [vmem:[%s1562_s30 + $0x150] sm:$0xff] }
  0x2d   : > { %v707_v58 = vld [vmem:[%s1562_s30 + $0x40] sm:$0xff]  ;;  %v757_v59 = vld [vmem:[%s1562_s30 + $0x1d0] sm:$0xff]  ;;  %v1332_v60 = vld [vmem:[%s1557_s27 + $0x8] sm:$0xff] }
  0x2e   : > { %585 = vmatpush.bf16.msra.mxu2 %v1204_v28  ;;  %v723_v61 = vld [vmem:[%s1562_s30 + $0xc0] sm:$0xff]  ;;  %v740_v62 = vld [vmem:[%s1562_s30 + $0x148] sm:$0xff]  ;;  %v706_v63 = vld [vmem:[%s1562_s30 + $0x38] sm:$0xff] }
  0x2f   : > { %604 = vmatpush.bf16.msra.mxu3 %v1208_v29  ;;  %547 = vmatpush.bf16.msra.mxu0 %v1196_v30  ;;  %v756_v0 = vld [vmem:[%s1562_s30 + $0x1c8] sm:$0xff]  ;;  %v722_v1 = vld [vmem:[%s1562_s30 + $0xb8] sm:$0xff]  ;;  %v705_v2 = vld [vmem:[%s1562_s30 + $0x30] sm:$0xff] }
  0x30   : > { %566 = vmatpush.bf16.msra.mxu1 %v1200_v31  ;;  %v739_v3 = vld [vmem:[%s1562_s30 + $0x140] sm:$0xff]  ;;  %v721_v5 = vld [vmem:[%s1562_s30 + $0xb0] sm:$0xff]  ;;  %v704_v6 = vld [vmem:[%s1562_s30 + $0x28] sm:$0xff] }
  0x31   : > { %586 = vmatmul.bf16.vlgmr.msra.gmra.mxu2 %v1331_v32  ;;  %v755_v4 = vld [vmem:[%s1562_s30 + $0x1c0] sm:$0xff]  ;;  %v738_v7 = vld [vmem:[%s1562_s30 + $0x138] sm:$0xff]  ;;  %v720_v9 = vld [vmem:[%s1562_s30 + $0xa8] sm:$0xff] }
  0x32   : > { %605 = vmatmul.bf16.vlgmr.msra.gmra.mxu3 %v1331_v32  ;;  %548 = vmatmul.bf16.vlgmr.msra.gmra.mxu0 %v1331_v32  ;;  %v754_v8 = vld [vmem:[%s1562_s30 + $0x1b8] sm:$0xff]  ;;  %v703_v10 = vld [vmem:[%s1562_s30 + $0x20] sm:$0xff]  ;;  %v737_v11 = vld [vmem:[%s1562_s30 + $0x130] sm:$0xff] }
  0x33   : > { %763 = vmatpush.msrb.mxu0 %v714_v33  ;;  %567 = vmatmul.bf16.vlgmr.msra.gmra.mxu1 %v1331_v32  ;;  %v753_v12 = vld [vmem:[%s1562_s30 + $0x1b0] sm:$0xff]  ;;  %v719_v13 = vld [vmem:[%s1562_s30 + $0xa0] sm:$0xff]  ;;  %v702_v14 = vld [vmem:[%s1562_s30 + $0x18] sm:$0xff] }
  0x34   : > { %792 = vmatpush.msrb.mxu1 %v730_v34  ;;  %821 = vmatpush.msrb.mxu2 %v746_v37  ;;  %v736_v15 = vld [vmem:[%s1562_s30 + $0x128] sm:$0xff]  ;;  %v718_v17 = vld [vmem:[%s1562_s30 + $0x98] sm:$0xff]  ;;  %v701_v18 = vld [vmem:[%s1562_s30 + $0x10] sm:$0xff] }
  0x35   : > { %764 = vmatpush.msrb.mxu0 %v713_v35  ;;  %850 = vmatpush.msrb.mxu3 %v762_v39  ;;  %v752_v16 = vld [vmem:[%s1562_s30 + $0x1a8] sm:$0xff]  ;;  %v735_v19 = vld [vmem:[%s1562_s30 + $0x120] sm:$0xff]  ;;  %v717_v21 = vld [vmem:[%s1562_s30 + $0x90] sm:$0xff] }
  0x36   : > { %793 = vmatpush.msrb.mxu1 %v729_v36  ;;  %822 = vmatpush.msrb.mxu2 %v745_v41  ;;  %v751_v20 = vld [vmem:[%s1562_s30 + $0x1a0] sm:$0xff]  ;;  %v700_v22 = vld [vmem:[%s1562_s30 + $0x8] sm:$0xff]  ;;  %v734_v24 = vld [vmem:[%s1562_s30 + $0x118] sm:$0xff] }
  0x37   : > { %765 = vmatpush.msrb.mxu0 %v712_v38  ;;  %851 = vmatpush.msrb.mxu3 %v761_v43  ;;  %v716_v23 = vld [vmem:[%s1562_s30 + $0x88] sm:$0xff]  ;;  %v750_v25 = vld [vmem:[%s1562_s30 + $0x198] sm:$0xff]  ;;  %v699_v26 = vld [vmem:[%s1562_s30] sm:$0xff] }
  0x38   : > { %794 = vmatpush.msrb.mxu1 %v728_v40  ;;  %823 = vmatpush.msrb.mxu2 %v744_v45  ;;  %v715_v27 = vld [vmem:[%s1562_s30 + $0x80] sm:$0xff]  ;;  %v733_v28 = vld [vmem:[%s1562_s30 + $0x110] sm:$0xff]  ;;  %v732_v30 = vld [vmem:[%s1562_s30 + $0x108] sm:$0xff] }
  0x39   : > { %766 = vmatpush.msrb.mxu0 %v711_v42  ;;  %852 = vmatpush.msrb.mxu3 %v760_v47  ;;  %v749_v29 = vld [vmem:[%s1562_s30 + $0x190] sm:$0xff]  ;;  %v748_v31 = vld [vmem:[%s1562_s30 + $0x188] sm:$0xff]  ;;  %v731_v32 = vld [vmem:[%s1562_s30 + $0x100] sm:$0xff] }
  0x3a   : > { %795 = vmatpush.msrb.mxu1 %v727_v44  ;;  %824 = vmatpush.msrb.mxu2 %v743_v49  ;;  %v747_v33 = vld [vmem:[%s1562_s30 + $0x180] sm:$0xff]  ;;  %v668_v35 = vld [vmem:[%s1634_s8 + $0x8] sm:$0xff]  ;;  %v669_v40 = vld [vmem:[%s1634_s8 + $0x10] sm:$0xff] }
  0x3b   : > { %767 = vmatpush.msrb.mxu0 %v710_v46  ;;  %853 = vmatpush.msrb.mxu3 %v759_v51  ;;  %v667_v34 = vld [vmem:[%s1634_s8] sm:$0xff]  ;;  %v670_v41 = vld [vmem:[%s1634_s8 + $0x18] sm:$0xff]  ;;  %v672_v47 = vld [vmem:[%s1634_s8 + $0x28] sm:$0xff] }
  0x3c   : > { %796 = vmatpush.msrb.mxu1 %v726_v48  ;;  %825 = vmatpush.msrb.mxu2 %v742_v53  ;;  %v671_v45 = vld [vmem:[%s1634_s8 + $0x20] sm:$0xff]  ;;  %v674_v53 = vld [vmem:[%s1634_s8 + $0x38] sm:$0xff] }
  0x3d   : > { %768 = vmatpush.msrb.mxu0 %v709_v50  ;;  %854 = vmatpush.msrb.mxu3 %v758_v55 }
  0x3e   : > { %797 = vmatpush.msrb.mxu1 %v725_v52  ;;  %826 = vmatpush.msrb.mxu2 %v741_v57  ;;  %v673_v52 = vld [vmem:[%s1634_s8 + $0x30] sm:$0xff]  ;;  %v675_v57 = vld [vmem:[%s1634_s8 + $0x40] sm:$0xff] }
  0x3f   : > { %769 = vmatpush.msrb.mxu0 %v708_v54  ;;  %855 = vmatpush.msrb.mxu3 %v757_v59  ;;  %v676_v59 = vld [vmem:[%s1634_s8 + $0x48] sm:$0xff] }
  0x40   : > { %798 = vmatpush.msrb.mxu1 %v724_v56  ;;  %827 = vmatpush.msrb.mxu2 %v740_v62 }
  0x41   : > { %770 = vmatpush.msrb.mxu0 %v707_v58  ;;  %591 = vmatmul.bf16.gmra.mxu2 %v1332_v60 }
  0x42   : > { %799 = vmatpush.msrb.mxu1 %v723_v61  ;;  %610 = vmatmul.bf16.gmra.mxu3 %v1332_v60 }
  0x43   : > { %771 = vmatpush.msrb.mxu0 %v706_v63  ;;  %572 = vmatmul.bf16.gmra.mxu1 %v1332_v60 }
  0x44   : > { %553 = vmatmul.bf16.gmra.mxu0 %v1332_v60  ;;  %856 = vmatpush.msrb.mxu3 %v756_v0  ;;  %v677_v0 = vld [vmem:[%s1634_s8 + $0x50] sm:$0xff] }
  0x45   : > { %800 = vmatpush.msrb.mxu1 %v722_v1  ;;  %772 = vmatpush.msrb.mxu0 %v705_v2  ;;  %v678_v1 = vld [vmem:[%s1634_s8 + $0x58] sm:$0xff] }
  0x46   : > { %828 = vmatpush.msrb.mxu2 %v739_v3  ;;  %857 = vmatpush.msrb.mxu3 %v755_v4 }
  0x47   : > { %801 = vmatpush.msrb.mxu1 %v721_v5  ;;  %773 = vmatpush.msrb.mxu0 %v704_v6  ;;  %v679_v5 = vld [vmem:[%s1634_s8 + $0x60] sm:$0xff] }
  0x48   : > { %829 = vmatpush.msrb.mxu2 %v738_v7  ;;  %858 = vmatpush.msrb.mxu3 %v754_v8  ;;  %v680_v7 = vld [vmem:[%s1634_s8 + $0x68] sm:$0xff] }
  0x49   : > { %802 = vmatpush.msrb.mxu1 %v720_v9  ;;  %774 = vmatpush.msrb.mxu0 %v703_v10 }
  0x4a   : > { %830 = vmatpush.msrb.mxu2 %v737_v11  ;;  %859 = vmatpush.msrb.mxu3 %v753_v12  ;;  %v681_v12 = vld [vmem:[%s1634_s8 + $0x70] sm:$0xff] }
  0x4b   : > { %803 = vmatpush.msrb.mxu1 %v719_v13  ;;  %775 = vmatpush.msrb.mxu0 %v702_v14  ;;  %v682_v13 = vld [vmem:[%s1634_s8 + $0x78] sm:$0xff] }
  0x4c   : > { %831 = vmatpush.msrb.mxu2 %v736_v15  ;;  %860 = vmatpush.msrb.mxu3 %v752_v16 }
  0x4d   : > { %804 = vmatpush.msrb.mxu1 %v718_v17  ;;  %776 = vmatpush.msrb.mxu0 %v701_v18 }
  0x4e   : > { %832 = vmatpush.msrb.mxu2 %v735_v19  ;;  %861 = vmatpush.msrb.mxu3 %v751_v20 }
  0x4f   : > { %805 = vmatpush.msrb.mxu1 %v717_v21  ;;  %777 = vmatpush.msrb.mxu0 %v700_v22 }
  0x50   : > { %833 = vmatpush.msrb.mxu2 %v734_v24  ;;  %862 = vmatpush.msrb.mxu3 %v750_v25 }
  0x51   : > { %806 = vmatpush.msrb.mxu1 %v716_v23  ;;  %778 = vmatpush.msrb.mxu0 %v699_v26 }
  0x52   : > { %834 = vmatpush.msrb.mxu2 %v733_v28  ;;  %863 = vmatpush.msrb.mxu3 %v749_v29 }
  0x53   : > { %807 = vmatpush.msrb.mxu1 %v715_v27 }
  0x54   : > { %835 = vmatpush.msrb.mxu2 %v732_v30  ;;  %864 = vmatpush.msrb.mxu3 %v748_v31 }
  0x56   : > { %836 = vmatpush.msrb.mxu2 %v731_v32  ;;  %865 = vmatpush.msrb.mxu3 %v747_v33 }
  0xaf   : > { %v549_v36 = vpop.f32.mrf.mxu0 }
  0xb0   : > { %v683_v37 = vmul.f32 %v667_v34, %v549_v36  ;;  %v568_v38 = vpop.f32.mrf.mxu1 }
  0xb1   : > { %v684_v39 = vmul.f32 %v668_v35, %v568_v38 }
  0xb2   : > { %779 = vmatmul.f32.vlgmr.msrb.gmra.mxu0 %v683_v37 }
  0xb3   : > { %808 = vmatmul.f32.vlgmr.msrb.gmra.mxu1 %v684_v39 }
  0xb4   : > { %v587_v42 = vpop.f32.mrf.mxu2 }
  0xb5   : > { %v685_v43 = vmul.f32 %v669_v40, %v587_v42  ;;  %v606_v44 = vpop.f32.mrf.mxu3 }
  0xb6   : > { %v686_v46 = vmul.f32 %v670_v41, %v606_v44 }
  0xb7   : > { %837 = vmatmul.f32.vlgmr.msrb.gmra.mxu2 %v685_v43  ;;  %v551_v48 = vpop.f32.mrf.mxu0 }
  0xb8   : > { %866 = vmatmul.f32.vlgmr.msrb.gmra.mxu3 %v686_v46  ;;  %v687_v49 = vmul.f32 %v671_v45, %v551_v48  ;;  %v570_v50 = vpop.f32.mrf.mxu1 }
  0xb9   : > { %v688_v51 = vmul.f32 %v672_v47, %v570_v50 }
  0xba   : > { %782 = vmatmul.f32.gmra.mxu0 %v687_v49 }
  0xbb   : > { %811 = vmatmul.f32.gmra.mxu1 %v688_v51 }
  0xbc   : > { %v589_v54 = vpop.f32.mrf.mxu2 }
  0xbd   : > { %v689_v55 = vmul.f32 %v673_v52, %v589_v54  ;;  %v608_v56 = vpop.f32.mrf.mxu3 }
  0xbe   : > { %v690_v58 = vmul.f32 %v674_v53, %v608_v56 }
  0xbf   : > { %840 = vmatmul.f32.gmra.mxu2 %v689_v55 }
  0xc0   : > { %869 = vmatmul.f32.gmra.mxu3 %v690_v58  ;;  %v573_v62 = vpop.f32.mrf.mxu1 }
  0xc1   : > { %v554_v60 = vpop.f32.mrf.mxu0  ;;  %v692_v63 = vmul.f32 %v676_v59, %v573_v62 }
  0xc2   : > { %v691_v61 = vmul.f32 %v675_v57, %v554_v60 }
  0xc3   : > { %814 = vmatmul.f32.gmra.mxu1 %v692_v63 }
  0xc4   : > { %785 = vmatmul.f32.gmra.mxu0 %v691_v61  ;;  %v592_v2 = vpop.f32.mrf.mxu2 }
  0xc5   : > { %v693_v3 = vmul.f32 %v677_v0, %v592_v2  ;;  %v611_v4 = vpop.f32.mrf.mxu3 }
  0xc6   : > { %v694_v6 = vmul.f32 %v678_v1, %v611_v4 }
  0xc7   : > { %843 = vmatmul.f32.gmra.mxu2 %v693_v3 }
  0xc8   : > { %872 = vmatmul.f32.gmra.mxu3 %v694_v6  ;;  %v575_v10 = vpop.f32.mrf.mxu1 }
  0xc9   : > { %v556_v8 = vpop.f32.mrf.mxu0  ;;  %v696_v11 = vmul.f32 %v680_v7, %v575_v10 }
  0xca   : > { %v695_v9 = vmul.f32 %v679_v5, %v556_v8 }
  0xcb   : > { %817 = vmatmul.f32.gmra.mxu1 %v696_v11 }
  0xcc   : > { %788 = vmatmul.f32.gmra.mxu0 %v695_v9  ;;  %v594_v14 = vpop.f32.mrf.mxu2 }
  0xcd   : > { %v697_v15 = vmul.f32 %v681_v12, %v594_v14  ;;  %v613_v16 = vpop.f32.mrf.mxu3 }
  0xce   : > { %v698_v17 = vmul.f32 %v682_v13, %v613_v16 }
  0xcf   : > { %846 = vmatmul.f32.gmra.mxu2 %v697_v15 }
  0xd0   : > { %875 = vmatmul.f32.gmra.mxu3 %v698_v17 }
 0x12f   : > { %v780_v18 = vpop.f32.mrf.mxu0 }
 0x130   : > { %v809_v19 = vpop.f32.mrf.mxu1 }
 0x131   : > { %v810_v24 = vadd.f32 %v809_v19, %v780_v18 }
 0x137   : > { %v783_v22 = vpop.f32.mrf.mxu0 }
 0x138   : > { %v812_v23 = vpop.f32.mrf.mxu1 }
 0x139   : > { %v813_v25 = vadd.f32 %v812_v23, %v783_v22 }
 0x13a   : > { %v838_v20 = vpop.f32.mrf.mxu2 }
 0x13b   : > { %v867_v21 = vpop.f32.mrf.mxu3  ;;  %v839_v31 = vadd.f32 %v838_v20, %v810_v24 }
 0x13d   : > { %v1656_v35 = vadd.f32 %v867_v21, %v839_v31 }
 0x13f   : > { %v879_v41 = vmul.f32 %v1656_v35, %v1656_v35 }
 0x140   : > { %v815_v30 = vpop.f32.mrf.mxu1 }
 0x141   : > { %v786_v29 = vpop.f32.mrf.mxu0  ;;  %v882_v46 = vsel %vm881_vm0, %v879_v41, 0.0 }
 0x142   : > { %v841_v26 = vpop.f32.mrf.mxu2  ;;  %v816_v33 = vadd.f32 %v815_v30, %v786_v29 }
 0x143   : > { %v842_v27 = vadd.f32 %v841_v26, %v813_v25  ;;  %v870_v28 = vpop.f32.mrf.mxu3 }
 0x145   : > { %v1652_v32 = vadd.f32 %v870_v28, %v842_v27 }
 0x147   : > { %v880_v34 = vmul.f32 %v1652_v32, %v1652_v32 }
 0x148   : > { %v818_v43 = vpop.f32.mrf.mxu1 }
 0x149   : > { %v885_v36 = vsel %vm881_vm0, %v880_v34, 0.0  ;;  %v789_v42 = vpop.f32.mrf.mxu0 }
 0x14a   : > { %v844_v37 = vpop.f32.mrf.mxu2  ;;  %886 = vadd.xlane.f32.xlu0 %v885_v36  ;;  %v819_v45 = vadd.f32 %v818_v43, %v789_v42 }
 0x14b   : > { %v845_v38 = vadd.f32 %v844_v37, %v816_v33  ;;  %v873_v39 = vpop.f32.mrf.mxu3 }
 0x14d   : > { %v1659_v40 = vadd.f32 %v873_v39, %v845_v38 }
 0x14f   : > { %v918_v44 = vmul.f32 %v1659_v40, %v1659_v40 }
 0x151   : > { %v920_v47 = vsel %vm881_vm0, %v918_v44, 0.0 }
 0x152   : > { %v847_v48 = vpop.f32.mrf.mxu2  ;;  %883 = vadd.xlane.f32.xlu0 %v882_v46  ;;  %921 = vadd.xlane.f32.xlu1 %v920_v47 }
 0x153   : > { %v848_v49 = vadd.f32 %v847_v48, %v819_v45  ;;  %v876_v50 = vpop.f32.mrf.mxu3 }
 0x155   : > { %v1667_v51 = vadd.f32 %v876_v50, %v848_v49  ;;  %v999_v50 = vlaneseq }
 0x157   : > { %v919_v52 = vmul.f32 %v1667_v51, %v1667_v51 }
 0x159   : > { %v923_v53 = vsel %vm881_vm0, %v919_v52, 0.0  ;;  %v1003_v52 = vand.u32 127, %v999_v50 }
 0x15a   : > { %924 = vadd.xlane.f32.xlu1 %v923_v53 }
 0x15b   : > { %vm1008_vm10 = vcmp.lt.s32.totalorder %v1003_v52, 6 }
 0x1bd   : > { %v887_v54 = vpop.xlane.xlu0 %886 }
 0x1be   : > { %1391 = vrsqrt.f32 %v887_v54  ;;  %vm907_vm1 = vcmp.eq.f32.partialorder %v887_v54, inf  ;;  %v910_v6 = vand.u32 2147483648, %v887_v54  ;;  %vm909_vm2 = vcmp.eq.f32.partialorder %v887_v54, 0.0 }
 0x1c4   : > { %v1392_v55 = vpop.eup %1391 }
 0x1c5   : > { %v901_v56 = vmul.f32 %v1392_v55, %v887_v54  ;;  %v884_v57 = vpop.xlane.xlu0 %883  ;;  %v922_v58 = vpop.xlane.xlu1 %921 }
 0x1c6   : > { %1393 = vrsqrt.f32 %v884_v57  ;;  %vm895_vm3 = vcmp.eq.f32.partialorder %v884_v57, inf  ;;  %vm897_vm4 = vcmp.eq.f32.partialorder %v884_v57, 0.0  ;;  %v898_v21 = vand.u32 2147483648, %v884_v57 }
 0x1c7   : > { %v902_v59 = vmul.f32 %v1392_v55, %v901_v56  ;;  %1395 = vrsqrt.f32 %v922_v58  ;;  %vm933_vm5 = vcmp.eq.f32.partialorder %v922_v58, inf  ;;  %v936_v24 = vand.u32 2147483648, %v922_v58 }
 0x1c8   : > { %vm935_vm6 = vcmp.eq.f32.partialorder %v922_v58, 0.0 }
 0x1c9   : > { %v903_v60 = vmul.f32 0.5, %v902_v59 }
 0x1cb   : > { %v904_v61 = vsub.f32 1.5, %v903_v60 }
 0x1cc   : > { %v1394_v62 = vpop.eup %1393 }
 0x1cd   : > { %v1396_v63 = vpop.eup %1395  ;;  %v905_v0 = vmul.f32 %v1392_v55, %v904_v61  ;;  %v889_v1 = vmul.f32 %v1394_v62, %v884_v57  ;;  %v925_v2 = vpop.xlane.xlu1 %924 }
 0x1ce   : > { %v927_v3 = vmul.f32 %v1396_v63, %v922_v58  ;;  %1397 = vrsqrt.f32 %v925_v2  ;;  %vm945_vm7 = vcmp.eq.f32.partialorder %v925_v2, inf  ;;  %v948_v38 = vand.u32 2147483648, %v925_v2 }
 0x1cf   : > { %v906_v4 = vmul.f32 %v905_v0, %v887_v54  ;;  %v890_v5 = vmul.f32 %v1394_v62, %v889_v1  ;;  %vm947_vm8 = vcmp.eq.f32.partialorder %v925_v2, 0.0 }
 0x1d0   : > { %v928_v7 = vmul.f32 %v1396_v63, %v927_v3 }
 0x1d1   : > { %v908_v8 = vsel %vm907_vm1, %v887_v54, %v906_v4  ;;  %v891_v9 = vmul.f32 0.5, %v890_v5 }
 0x1d2   : > { %v911_v10 = vsel %vm909_vm2, %v910_v6, %v908_v8  ;;  %v929_v11 = vmul.f32 0.5, %v928_v7 }
 0x1d3   : > { %v913_v12 = vadd.f32 1e-07, %v911_v10  ;;  %v892_v13 = vsub.f32 1.5, %v891_v9 }
 0x1d4   : > { %v1398_v14 = vpop.eup %1397  ;;  %v930_v15 = vsub.f32 1.5, %v929_v11 }
 0x1d5   : > { %1399 = vrcp.f32 %v913_v12  ;;  %v893_v16 = vmul.f32 %v1394_v62, %v892_v13  ;;  %v939_v17 = vmul.f32 %v1398_v14, %v925_v2 }
 0x1d6   : > { %v931_v18 = vmul.f32 %v1396_v63, %v930_v15 }
 0x1d7   : > { %v894_v19 = vmul.f32 %v893_v16, %v884_v57  ;;  %v940_v20 = vmul.f32 %v1398_v14, %v939_v17 }
 0x1d8   : > { %v932_v22 = vmul.f32 %v931_v18, %v922_v58 }
 0x1d9   : > { %v896_v23 = vsel %vm895_vm3, %v884_v57, %v894_v19  ;;  %v941_v25 = vmul.f32 0.5, %v940_v20 }
 0x1da   : > { %v899_v26 = vsel %vm897_vm4, %v898_v21, %v896_v23  ;;  %v934_v27 = vsel %vm933_vm5, %v922_v58, %v932_v22 }
 0x1db   : > { %v1400_v28 = vpop.eup %1399  ;;  %v942_v29 = vsub.f32 1.5, %v941_v25  ;;  %v912_v30 = vadd.f32 1e-07, %v899_v26  ;;  %v937_v31 = vsel %vm935_vm6, %v936_v24, %v934_v27 }
 0x1dc   : > { %v917_v33 = vmul.f32 %v1400_v28, %v1652_v32  ;;  %v950_v34 = vadd.f32 1e-07, %v937_v31 }
 0x1dd   : > { %v943_v36 = vmul.f32 %v1398_v14, %v942_v29  ;;  %1401 = vrcp.f32 %v912_v30 }
 0x1de   : > { %1321 = vmatpush.xpose.msk.msra.mxu0 %vm881_vm0, %v917_v33  ;;  %1365 = vmatpush.xpose.msk.msra.mxu1 %vm881_vm0, %v917_v33  ;;  %1403 = vrcp.f32 %v950_v34 }
 0x1df   : > { %v944_v37 = vmul.f32 %v943_v36, %v925_v2 }
 0x1e1   : > { %v946_v39 = vsel %vm945_vm7, %v925_v2, %v944_v37 }
 0x1e2   : > { %v949_v41 = vsel %vm947_vm8, %v948_v38, %v946_v39 }
 0x1e3   : > { %v1402_v42 = vpop.eup %1401  ;;  %v951_v43 = vadd.f32 1e-07, %v949_v41 }
 0x1e4   : > { %v1404_v44 = vpop.eup %1403  ;;  %v916_v45 = vmul.f32 %v1402_v42, %v1656_v35  ;;  %v1000_v35 = vshrl.u32 %v999_v50, 7 }
 0x1e5   : > { %1405 = vrcp.f32 %v951_v43  ;;  %v954_v32 = vmul.f32 %v1404_v44, %v1659_v40 }
 0x1e6   : > { %1322 = vmatpush.xpose.msk.msra.mxu0 %vm881_vm0, %v916_v45  ;;  %1366 = vmatpush.xpose.msk.msra.mxu1 %vm881_vm0, %v916_v45  ;;  %vm1004_vm9 = vcmp.eq.s32.totalorder %v1000_v35, %v1003_v52  ;;  %vm1052_vm12 = vcmp.lt.s32.totalorder %v1000_v35, 6 }
 0x1e7   : > { %v956_v46 = vmul.f32 %v954_v32, %v916_v45 }
 0x1e9   : > { %v958_v47 = vsel %vm881_vm0, %v956_v46, 0.0  ;;  %1323 = vmatmul.msk.f32.vlgmr.msra.gmra.mxu0 %vm881_vm0, %v954_v32 }
 0x1ea   : > { %959 = vadd.xlane.f32.xlu2 %v958_v47 }
 0x1eb   : > { %v1406_v48 = vpop.eup %1405 }
 0x1ec   : > { %v955_v49 = vmul.f32 %v1406_v48, %v1667_v51 }
 0x1ee   : > { %1324 = vmatmul.msk.f32.vlgmr.msra.gmra.mxu1 %vm881_vm0, %v955_v49 }
 0x25d   : > { %v960_v58 = vpop.xlane.xlu2 %959 }
 0x25e   : > { %v1011_v59 = vmul.f32 14.285714, %v960_v58 }
 0x266   : > { %v993_v40 = vpop.f32.mrf.mxu0 }
 0x267   : > { %v1006_v53 = vsel %vm1004_vm9, -10.0, %v993_v40 }
 0x268   : > { %v1009_v54 = vsel %vm1008_vm10, %v1006_v53, -1e+09 }
 0x269   : > { %v1013_v55 = vmul.f32 14.285714, %v1009_v54 }
 0x26b   : > { %v996_v56 = vpop.f32.mrf.mxu1  ;;  %v1016_v57 = vsel %vm1015_vm11, %v1013_v55, -inf }
 0x26c   : > { %1017 = vmax.xlane.f32.xlu2 %v1016_v57 }
 0x2df   : > { %v1018_v60 = vpop.xlane.xlu2 %1017 }
 0x2e0   : > { %v1022_v61 = vmax.f32 %v1018_v60, %v1011_v59 }
 0x2e2   : > { %v1030_v51 = vsub.f32 %v1013_v55, %v1022_v61  ;;  %v1024_v1 = vsub.f32 %v1011_v59, %v1022_v61 }
 0x2e4   : > { %v1032_v62 = vmul.f32 1.442695, %v1030_v51  ;;  %v1026_v2 = vmul.f32 1.442695, %v1024_v1 }
 0x2e6   : > { %1407 = vpow2.f32 %v1032_v62 }
 0x2e7   : > { %1409 = vpow2.f32 %v1026_v2 }
 0x2ec   : > { %v1408_v63 = vpop.eup %1407 }
 0x2ed   : > { %v1036_v0 = vsel %vm1015_vm11, %v1408_v63, 0.0  ;;  %v1410_v3 = vpop.eup %1409 }
 0x2ee   : > { %1037 = vadd.xlane.f32.xlu0 %v1036_v0 }
 0x361   : > { %v1038_v4 = vpop.xlane.xlu0 %1037 }
 0x362   : > { %v1042_v5 = vadd.f32 %v1410_v3, %v1038_v4 }
 0x364   : > { %1411 = vlog2.f32 %v1042_v5 }
 0x36a   : > { %v1412_v6 = vpop.eup %1411 }
 0x36b   : > { %v1045_v7 = vmul.f32 0.6931472, %v1412_v6 }
 0x36d   : > { %v1048_v8 = vadd.f32 %v1045_v7, %v1022_v61 }
 0x36f   : > { %v1050_v9 = vsub.f32 %v1048_v8, %v1011_v59 }
 0x371   : > { %v1054_v10 = vsel %vm1052_vm12, %v1050_v9, 0.0 }
 0x372   : > { %v1057_v11 = vrot.slane %v1054_v10, 4 }
 0x374   : > { %v1058_v12 = vadd.f32 %v1057_v11, %v1054_v10 }
 0x376   : > { %v1059_v13 = vrot.slane %v1058_v12, 2 }
 0x378   : > { %v1060_v14 = vadd.f32 %v1059_v13, %v1058_v12 }
 0x37a   : > { %v1061_v15 = vrot.slane %v1060_v14, 1 }
 0x37c   : > { %v1062_v16 = vadd.f32 %v1061_v15, %v1060_v14 }
 0x37e   : > { %v1063_v17 = vmul.f32 0.16666667, %v1062_v16 }
 0x380   : > { %1065 = vst.msk [vmem:[%s295_s11] sm:$0x1] %vm1064_vm13, %v1063_v17 }
 0x381 PF: > { %s14_s17 = sadd.s32 1, %s1435_s17   ;;  %s1701_s15 = smov %s1431_s16 }
 0x382   : > { %p11_p5 = scmp.ge.s32.totalorder %s14_s17, 5   ;;  %s1702_s16 = smov %s1704_s18 }
 0x384   :  { %13 = sbr.rel (!%p11_p5) target bundleno = 2 (0x2), region = 83 }

</bundles_post_ra>
